<compile_context>
chip_gen: v7x
topology: tpu7x:2x2x1
jax: 0.10.0
libtpu: 0.0.40
codegen_flags: <defaults>
</compile_context>

<pallas_src>
import jax
import jax.numpy as jnp
from jax.experimental import pallas as pl
from jax.experimental.pallas import tpu as pltpu

OUT_H, OUT_W = 256, 512          # fixed by F.interpolate(size=(256, 512)) in the module


# ------------------------- interpolation matrices (setup glue) --------------------------
def _interp_matrix(in_size, out_size):
    """(out_size, in_size) linear-interpolation matrix matching PyTorch bilinear with
    align_corners=False: half-pixel centers, negative source coords clamped to 0,
    upper neighbour index clamped to in_size - 1 (edge replication)."""
    scale = in_size / out_size
    dst = jnp.arange(out_size, dtype=jnp.float32)
    src = jnp.maximum((dst + 0.5) * scale - 0.5, 0.0)
    i0 = jnp.minimum(jnp.floor(src), in_size - 1).astype(jnp.int32)
    i1 = jnp.minimum(i0 + 1, in_size - 1)
    frac = src - i0.astype(jnp.float32)
    cols = jnp.arange(in_size, dtype=jnp.int32)[None, :]
    return ((cols == i0[:, None]).astype(jnp.float32) * (1.0 - frac)[:, None]
            + (cols == i1[:, None]).astype(jnp.float32) * frac[:, None])


# --------------------------------- Pallas kernel ----------------------------------------
def _bilinear_kernel(x_ref, ay_ref, axt_ref, o_ref):
    # x_ref  : (H_in, W_in)      depth map for this batch element (batch dim squeezed)
    # ay_ref : (TILE_H, H_in)    row weights for this output-row tile
    # axt_ref: (W_in, OUT_W)     column weights, pre-transposed
    # o_ref  : (TILE_H, OUT_W)   (batch / channel dims squeezed)
    # Column interpolation first -> both matmuls produce lane-dense 512-wide results.
    tmp = jnp.dot(x_ref[...], axt_ref[...], preferred_element_type=jnp.float32)   # (H_in, 512)
    o_ref[...] = jnp.dot(ay_ref[...], tmp, preferred_element_type=jnp.float32)    # (TILE_H, 512)


def bilinear_resize_256x512(depth):
    """depth: (B, H_in, W_in) -> (B, 1, 256, 512) float32; exactly
    F.interpolate(depth.unsqueeze(1), (256, 512), mode='bilinear', align_corners=False)."""
    depth = depth.astype(jnp.float32)
    B, H_in, W_in = depth.shape
    a_y = _interp_matrix(H_in, OUT_H)            # (256, H_in)
    a_xt = _interp_matrix(W_in, OUT_W).T         # (W_in, 512)

    # Fewest grid steps possible while keeping >= 2 "parallel" steps for v7x's 2 TCs.
    tile_h = OUT_H if B >= 2 else OUT_H // 2     # 256 when B>=2, 128 when B==1
    n_tiles = OUT_H // tile_h

    return pl.pallas_call(
        _bilinear_kernel,
        out_shape=jax.ShapeDtypeStruct((B, 1, OUT_H, OUT_W), jnp.float32),
        grid=(B, n_tiles),
        in_specs=[
            pl.BlockSpec((pl.Squeezed(), H_in, W_in), lambda b, t: (b, 0, 0)),
            pl.BlockSpec((tile_h, H_in), lambda b, t: (t, 0)),
            pl.BlockSpec((W_in, OUT_W), lambda b, t: (0, 0)),
        ],
        out_specs=pl.BlockSpec(
            (pl.Squeezed(), pl.Squeezed(), tile_h, OUT_W), lambda b, t: (b, 0, t, 0)),
        compiler_params=pltpu.CompilerParams(
            dimension_semantics=("parallel", "parallel")),
    )(depth, a_y, a_xt)


# --------------------------------- forward pass -----------------------------------------
def depth_extract_forward(masked_depth):
    # TODO(synk): the frozen torch.hub MiDaS backbone that would map masked_img (B,3,H,W)
    # to masked_depth (B,H,W) cannot be reproduced without its pretrained weights; this
    # forward starts from the backbone's depth output.
    return bilinear_resize_256x512(masked_depth)


# -------------------- independent reference (gather/lerp bilinear) ----------------------
def _ref_bilinear(x, out_h, out_w):
    """Pure-JAX gather-based bilinear, align_corners=False (torch F.interpolate
    semantics); built independently of _interp_matrix to cross-validate the kernel."""
    B, H, W = x.shape

    def coords(in_size, out_size):
        scale = in_size / out_size
        src = (jnp.arange(out_size, dtype=jnp.float32) + 0.5) * scale - 0.5
        src = jnp.clip(src, 0.0, in_size - 1.0)
        i0 = jnp.floor(src).astype(jnp.int32)
        i1 = jnp.minimum(i0 + 1, in_size - 1)
        return i0, i1, src - i0.astype(jnp.float32)

    y0, y1, fy = coords(H, out_h)
    x0, x1, fx = coords(W, out_w)
    r0 = x[:, y0, :]                                   # (B, out_h, W)
    r1 = x[:, y1, :]
    rows = r0 * (1.0 - fy)[None, :, None] + r1 * fy[None, :, None]
    c0 = rows[:, :, x0]                                # (B, out_h, out_w)
    c1 = rows[:, :, x1]
    out = c0 * (1.0 - fx)[None, None, :] + c1 * fx[None, None, :]
    return out[:, None]


# ------------------------------------- main ----------------------------------------------
if __name__ == "__main__":
    key = jax.random.PRNGKey(0)
    k1, k2 = jax.random.split(key)

    fwd = jax.jit(depth_extract_forward)

    # Case 1: B=2 (grid=(2,1), TILE_H=256), upscale in both dims (MiDaS-style stand-in).
    B, H_IN, W_IN = 2, 48, 96
    d1 = jax.random.normal(k1, (B, H_IN, W_IN), jnp.float32)
    out1 = jax.block_until_ready(fwd(d1))
    ref1 = _ref_bilinear(d1, OUT_H, OUT_W)
    assert out1.shape == (B, 1, OUT_H, OUT_W), out1.shape
    assert bool(jnp.all(jnp.isfinite(out1)))
    assert bool(jnp.allclose(out1, ref1, rtol=1e-4, atol=1e-4))

    # Case 2: B=1 (grid=(1,2), TILE_H=128), downscale along W (W_IN > 512).
    d2 = jax.random.normal(k2, (1, 40, 544), jnp.float32)
    out2 = jax.block_until_ready(jax.jit(depth_extract_forward)(d2))
    ref2 = _ref_bilinear(d2, OUT_H, OUT_W)
    assert out2.shape == (1, 1, OUT_H, OUT_W), out2.shape
    assert bool(jnp.all(jnp.isfinite(out2)))
    assert bool(jnp.allclose(out2, ref2, rtol=1e-4, atol=1e-4))

    print("KERNEL_OK")
</pallas_src>

<mosaic_0001>
module attributes {stable_mosaic.version = 11 : i64} {
  func.func @_bilinear_kernel(%arg0: i32, %arg1: i32, %arg2: memref<1x48x96xf32, #tpu.memory_space<vmem>>, %arg3: memref<256x48xf32, #tpu.memory_space<vmem>>, %arg4: memref<96x512xf32, #tpu.memory_space<vmem>>, %arg5: memref<1x1x256x512xf32, #tpu.memory_space<vmem>>) attributes {dimension_semantics = [#tpu.dimension_semantics<parallel>, #tpu.dimension_semantics<parallel>], iteration_bounds = array<i64: 2, 1>, scalar_prefetch = 0 : i64, scratch_operands = 0 : i64, tpu.core_type = #tpu.core_type<tc>, window_params = [{transform_indices = @transform_0, window_bounds = array<i64: 1, 48, 96>}, {transform_indices = @transform_1, window_bounds = array<i64: 256, 48>}, {pipeline_mode = #tpu.pipeline_mode<synchronous>, transform_indices = @transform_2, window_bounds = array<i64: 96, 512>}, {transform_indices = @transform_3, window_bounds = array<i64: 1, 1, 256, 512>}]} {
    %c0 = arith.constant 0 : index
    %c0_0 = arith.constant 0 : index
    %c0_1 = arith.constant 0 : index
    %0 = vector.load %arg2[%c0, %c0_0, %c0_1] : memref<1x48x96xf32, #tpu.memory_space<vmem>>, vector<1x48x96xf32>
    %1 = vector.shape_cast %0 : vector<1x48x96xf32> to vector<48x96xf32>
    %c0_2 = arith.constant 0 : index
    %c0_3 = arith.constant 0 : index
    %2 = vector.load %arg4[%c0_2, %c0_3] : memref<96x512xf32, #tpu.memory_space<vmem>>, vector<96x512xf32>
    %cst = arith.constant dense<0.000000e+00> : vector<48x512xf32>
    %3 = tpu.matmul %1, %2, %cst {dimension_numbers = #tpu.dot_dimension_numbers<[1], [0], [0], [1], [0, 0, 1, 1], [], []>} : vector<48x96xf32>, vector<96x512xf32>, vector<48x512xf32> -> vector<48x512xf32>
    %c0_4 = arith.constant 0 : index
    %c0_5 = arith.constant 0 : index
    %4 = vector.load %arg3[%c0_4, %c0_5] : memref<256x48xf32, #tpu.memory_space<vmem>>, vector<256x48xf32>
    %cst_6 = arith.constant dense<0.000000e+00> : vector<256x512xf32>
    %5 = tpu.matmul %4, %3, %cst_6 {dimension_numbers = #tpu.dot_dimension_numbers<[1], [0], [0], [1], [0, 0, 1, 1], [], []>} : vector<256x48xf32>, vector<48x512xf32>, vector<256x512xf32> -> vector<256x512xf32>
    %c0_7 = arith.constant 0 : index
    %c0_8 = arith.constant 0 : index
    %c0_9 = arith.constant 0 : index
    %c0_10 = arith.constant 0 : index
    %6 = vector.load %arg5[%c0_7, %c0_8, %c0_9, %c0_10] : memref<1x1x256x512xf32, #tpu.memory_space<vmem>>, vector<1x1x256x512xf32>
    %7 = vector.shape_cast %6 : vector<1x1x256x512xf32> to vector<256x512xf32>
    %8 = vector.shape_cast %5 : vector<256x512xf32> to vector<1x1x256x512xf32>
    tpu.vector_store %arg5[%c0_7, %c0_8, %c0_9, %c0_10], %8 {strides = array<i32>} : memref<1x1x256x512xf32, #tpu.memory_space<vmem>>, vector<1x1x256x512xf32>,
    return
  }
  func.func @transform_0(%arg0: i32, %arg1: i32) -> (i32, i32, i32) {
    %c0_i32 = arith.constant 0 : i32
    %c0_i32_0 = arith.constant 0 : i32
    %c0_i32_1 = arith.constant 0 : i32
    return %arg0, %c0_i32, %c0_i32_0 : i32, i32, i32
  }
  func.func @transform_1(%arg0: i32, %arg1: i32) -> (i32, i32) {
    %c0_i32 = arith.constant 0 : i32
    %c0_i32_0 = arith.constant 0 : i32
    return %arg1, %c0_i32 : i32, i32
  }
  func.func @transform_2(%arg0: i32, %arg1: i32) -> (i32, i32) {
    %c0_i32 = arith.constant 0 : i32
    %c0_i32_0 = arith.constant 0 : i32
    %c0_i32_1 = arith.constant 0 : i32
    return %c0_i32, %c0_i32_0 : i32, i32
  }
  func.func @transform_3(%arg0: i32, %arg1: i32) -> (i32, i32, i32, i32) {
    %c0_i32 = arith.constant 0 : i32
    %c0_i32_0 = arith.constant 0 : i32
    %c0_i32_1 = arith.constant 0 : i32
    return %arg0, %c0_i32, %arg1, %c0_i32_0 : i32, i32, i32, i32
  }
}

</mosaic_0001>

<bundles_post_ra>
// kernel: depth_extract_forward.1
= control target key start
LH: loop header
LB: loop body
LE: loop exit
PB: predicated region body
PF: predicated region fallthrough
CT: control target
= control target key end

     0   :  { %8 = vsyncpa [#allocation3], 0  ;;  %s2326_s0 = inlined_call_operand.vmem [shape: f32[2,48,96], index: 0, kind: input, shape index: {}]   ;;  %s2327_s1 = inlined_call_operand.vmem [shape: f32[256,48], index: 1, kind: input, shape index: {}]   ;;  %s2328_s2 = inlined_call_operand.vmem [shape: f32[96,512], index: 2, kind: input, shape index: {}]   ;;  %s2329_s3 = inlined_call_operand.hbm [shape: f32[2,1,256,512], index: 3, kind: output, shape index: {}]  }
   0x1   :  { %10 = vsyncpa [#allocation3 + $0x1], 0  ;;  %s1682_s12 = smov 0   ;;  %s1684_s13 = smov 0  }
   0x2   :  { %s1686_s14 = smov 0   ;;  %s1688_s15 = smov 0  }
   0x3   :  { %s1690_s16 = smov 0   ;;  %s1692_s17 = smov 0  }
   0x4 LB: > { %s1357_s18 = sadd.s32 4294967295, %s1656_s17   ;;  %s1358_s19 = sadd.s32 4294967294, %s1656_s17   ;;  %s1656_s17 = sphi %s1692_s17, %s16_s17   ;;  %s1652_s16 = sphi %s1690_s16, %s2336_s16   ;;  %s1648_s15 = sphi %s1688_s15, %s2335_s15   ;;  %s1644_s14 = sphi %s1686_s14, %s2334_s14   ;;  %s1640_s13 = sphi %s1684_s13, %s2333_s13   ;;  %s1636_s12 = sphi %s1682_s12, %s2332_s12  }
   0x5   : > { %s28_s20 = sadd.s32 1, %s1652_s16  ;;  %s110_s21 = sadd.s32 1, %s1644_s14 }
   0x6   : > { %p30_p0 = scmp.ge.s32.totalorder %s28_s20, 2  ;;  %p120_p1 = scmp.ne.s32.totalorder %s1644_s14, %s1640_s13 }
   0x7   : > { %p121_p2 = scmp.eq.s32.totalorder %s1357_s18, 1  ;;  %p126_p3 = scmp.ne.s32.totalorder %s1640_s13, %s1636_s12 }
   0x8   : > { %s2338_s20 = smov (%p30_p0, %s28_s20), 0  ;;  %p127_p5 = scmp.eq.s32.totalorder %s1358_s19, 1 }
   0x9   : > { %p1722_p4 = por %p121_p2, %p120_p1  ;;  %s105_s23 = ssub.s32 %s1652_s16, %s2338_s20 }
   0xa   : > { %p1362_p6 = scmp.ge.s32.totalorder %s1656_s17, 1  ;;  %p108_p7 = scmp.eq.s32.totalorder %s105_s23, 0 }
   0xb   : > { %p1729_p8 = por %p127_p5, %p126_p3  ;;  %p165_p9 = scmp.lt.s32.totalorder %s1656_s17, 3 }
   0xc   : > { %s1735_s25 = scalar_select %p108_p7, %s1644_s14, %s110_s21  }
   0xd   : > { %p166_p10 = pnand %p1362_p6, %p165_p9 }
   0xe   : > { %v213_v0 = vld [vmem:[%s2328_s2 + $0x8] sm:$0xff] (!%p166_p10)  ;;  %v215_v2 = vld [vmem:[%s2328_s2 + $0x18] sm:$0xff] (!%p166_p10)  ;;  %v212_v5 = vld [vmem:[%s2328_s2] sm:$0xff] (!%p166_p10)  ;;  %v1658_v7 = vmov (!%p166_p10), 0.0   ;;  %p194_p11 = scmp.lt.s32.totalorder (!%p166_p10), %s1648_s15, 1  ;;  %vm260_vm0 = vcmask (!%p166_p10), 785408  }
   0xf   : > { %169 = sbr.rel (%p166_p10) target bundleno = 634 (0x27a), region = 32  ;;  %v217_v1 = vld [vmem:[%s2328_s2 + $0x28] sm:$0xff] (!%p166_p10)  ;;  %v219_v4 = vld [vmem:[%s2328_s2 + $0x38] sm:$0xff] (!%p166_p10)  ;;  %v216_v6 = vld [vmem:[%s2328_s2 + $0x20] sm:$0xff] (!%p166_p10)  ;;  %343 = vmatprep.mubr.f32.mxu0 (!%p166_p10), %v1658_v7  ;;  %444 = vmatprep.mubr.f32.mxu1 (!%p166_p10), %v1658_v7  ;;  %vm513_vm1 = vcmask (!%p166_p10), 392192   ;;  %s191_s18 = sand.u32 (!%p166_p10), 1, %s1640_s13  }
  0x10   : > { %v1447_v3 = vpack.c.bf16 (!%p166_p10), %v217_v1, %v213_v0  ;;  %v1471_v8 = vpack.c.bf16 (!%p166_p10), %v219_v4, %v215_v2  ;;  %v1449_v9 = vpack.c.bf16 (!%p166_p10), %v216_v6, %v212_v5  ;;  %v214_v10 = vld [vmem:[%s2328_s2 + $0x10] sm:$0xff] (!%p166_p10)  ;;  %v221_v12 = vld [vmem:[%s2328_s2 + $0x48] sm:$0xff] (!%p166_p10)  ;;  %v223_v15 = vld [vmem:[%s2328_s2 + $0x58] sm:$0xff] (!%p166_p10)  ;;  %s1363_s19 = sshll.u32 (!%p166_p10), %s191_s18, 10  ;;  %s1659_s30 = smov (!%p166_p10), [#allocation2]  }
  0x11   : > { %v218_v11 = vld [vmem:[%s2328_s2 + $0x30] sm:$0xff] (!%p166_p10)  ;;  %v225_v14 = vld [vmem:[%s2328_s2 + $0x68] sm:$0xff] (!%p166_p10)  ;;  %v227_v16 = vld [vmem:[%s2328_s2 + $0x78] sm:$0xff] (!%p166_p10)  ;;  %s2139_s21 = scalar_lea.vmem (!%p166_p10), [#allocation2], %s1363_s19  ;;  %s1582_s4 = sshll.u32 (!%p166_p10), %s1659_s30, 4  ;;  %s1583_s4 = int_to_ptr.vmem [resolvable:$false] %s1582_s4 }
  0x12   : > { %1448 = vmatprep.subr.bf16.mxu0 (!%p166_p10), %v1447_v3  ;;  %v1473_v13 = vpack.c.bf16 (!%p166_p10), %v218_v11, %v214_v10  ;;  %1472 = vmatprep.subr.bf16.mxu1 (!%p166_p10), %v1471_v8  ;;  %v1451_v17 = vpack.c.bf16 (!%p166_p10), %v225_v14, %v221_v12  ;;  %v1475_v18 = vpack.c.bf16 (!%p166_p10), %v227_v16, %v223_v15  ;;  %v220_v19 = vld [vmem:[%s2328_s2 + $0x40] sm:$0xff] (!%p166_p10)  ;;  %v222_v21 = vld [vmem:[%s2328_s2 + $0x50] sm:$0xff] (!%p166_p10)  ;;  %v229_v24 = vld [vmem:[%s2328_s2 + $0x88] sm:$0xff] (!%p166_p10)  ;;  %s1584_s5 = scalar_lea.vmem (!%p166_p10), %s1583_s4, 32768 }
  0x13   : > { %1450 = vmatpush1.bf16.msra.mxu0 (!%p166_p10), %v1449_v9  ;;  %v224_v20 = vld [vmem:[%s2328_s2 + $0x60] sm:$0xff] (!%p166_p10)  ;;  %v226_v23 = vld [vmem:[%s2328_s2 + $0x70] sm:$0xff] (!%p166_p10)  ;;  %v233_v25 = vld [vmem:[%s2328_s2 + $0xa8] sm:$0xff] (!%p166_p10) }
  0x14   : > { %1474 = vmatpush1.bf16.msra.mxu1 (!%p166_p10), %v1473_v13  ;;  %v1453_v22 = vpack.c.bf16 (!%p166_p10), %v224_v20, %v220_v19  ;;  %1452 = vmatprep.subr.bf16.mxu0 (!%p166_p10), %v1451_v17  ;;  %v1477_v26 = vpack.c.bf16 (!%p166_p10), %v226_v23, %v222_v21  ;;  %v1455_v27 = vpack.c.bf16 (!%p166_p10), %v233_v25, %v229_v24  ;;  %v231_v28 = vld [vmem:[%s2328_s2 + $0x98] sm:$0xff] (!%p166_p10)  ;;  %v228_v30 = vld [vmem:[%s2328_s2 + $0x80] sm:$0xff] (!%p166_p10)  ;;  %v230_v33 = vld [vmem:[%s2328_s2 + $0x90] sm:$0xff] (!%p166_p10) }
  0x15   : > { %1476 = vmatprep.subr.bf16.mxu1 (!%p166_p10), %v1475_v18  ;;  %v235_v29 = vld [vmem:[%s2328_s2 + $0xb8] sm:$0xff] (!%p166_p10)  ;;  %v232_v32 = vld [vmem:[%s2328_s2 + $0xa0] sm:$0xff] (!%p166_p10)  ;;  %v234_v34 = vld [vmem:[%s2328_s2 + $0xb0] sm:$0xff] (!%p166_p10) }
  0x16   : > { %v1479_v31 = vpack.c.bf16 %v235_v29, %v231_v28  ;;  %v1457_v35 = vpack.c.bf16 %v232_v32, %v228_v30  ;;  %v237_v36 = vld [vmem:[%s2328_s2 + $0xc8] sm:$0xff]  ;;  %v239_v38 = vld [vmem:[%s2328_s2 + $0xd8] sm:$0xff]  ;;  %v1481_v39 = vpack.c.bf16 %v234_v34, %v230_v33  ;;  %v236_v42 = vld [vmem:[%s2328_s2 + $0xc0] sm:$0xff]  ;;  %s195_s9 = scalar_select %p194_p11, %s1648_s15, 1 }
  0x17   : > { %1454 = vmatpush1.bf16.msra.mxu0 %v1453_v22  ;;  %v241_v37 = vld [vmem:[%s2328_s2 + $0xe8] sm:$0xff]  ;;  %v243_v41 = vld [vmem:[%s2328_s2 + $0xf8] sm:$0xff]  ;;  %v240_v43 = vld [vmem:[%s2328_s2 + $0xe0] sm:$0xff] }
  0x18   : > { %1478 = vmatpush1.bf16.msra.mxu1 %v1477_v26  ;;  %1456 = vmatprep.subr.bf16.mxu0 %v1455_v27  ;;  %v1459_v40 = vpack.c.bf16 %v241_v37, %v237_v36  ;;  %v1483_v44 = vpack.c.bf16 %v243_v41, %v239_v38  ;;  %v238_v45 = vld [vmem:[%s2328_s2 + $0xd0] sm:$0xff]  ;;  %v245_v47 = vld [vmem:[%s2328_s2 + $0x108] sm:$0xff]  ;;  %v247_v49 = vld [vmem:[%s2328_s2 + $0x118] sm:$0xff]  ;;  %v1461_v51 = vpack.c.bf16 %v240_v43, %v236_v42  ;;  %s1519_s7 = smul.u32 48, %s195_s9  ;;  %s1269_s9 = sshll.u32 %s2139_s21, 4  ;;  %s2272_s9 = int_to_ptr.vmem [resolvable:$true] %s1269_s9 }
  0x19   : > { %1480 = vmatprep.subr.bf16.mxu1 %v1479_v31  ;;  %v242_v46 = vld [vmem:[%s2328_s2 + $0xf0] sm:$0xff]  ;;  %v249_v48 = vld [vmem:[%s2328_s2 + $0x128] sm:$0xff]  ;;  %v251_v50 = vld [vmem:[%s2328_s2 + $0x138] sm:$0xff]  ;;  %s1578_s29 = scalar_lea.vmem %s2272_s9, 16384  ;;  %p1585_p1 = scmp.lt.s32.totalorder %s2272_s9, %s1583_s4 }
  0x1a   : > { %v1485_v52 = vpack.c.bf16 %v242_v46, %v238_v45  ;;  %v1463_v53 = vpack.c.bf16 %v249_v48, %v245_v47  ;;  %v244_v54 = vld [vmem:[%s2328_s2 + $0x100] sm:$0xff]  ;;  %v246_v56 = vld [vmem:[%s2328_s2 + $0x110] sm:$0xff]  ;;  %v1487_v57 = vpack.c.bf16 %v251_v50, %v247_v49  ;;  %v253_v59 = vld [vmem:[%s2328_s2 + $0x148] sm:$0xff]  ;;  %s198_s23 = scalar_lea.vmem %s2326_s0, %s1519_s7  ;;  %p1579_p12 = scmp.ne.s32.totalorder %s2272_s9, %s1578_s29 }
  0x1b   : > { %1458 = vmatpush1.bf16.msra.mxu0 %v1457_v35  ;;  %v248_v55 = vld [vmem:[%s2328_s2 + $0x120] sm:$0xff]  ;;  %v250_v58 = vld [vmem:[%s2328_s2 + $0x130] sm:$0xff]  ;;  %v257_v60 = vld [vmem:[%s2328_s2 + $0x168] sm:$0xff]  ;;  %p1586_p2 = scmp.lt.s32.totalorder %s1584_s5, %s1578_s29 }
  0x1c   : > { %1482 = vmatpush1.bf16.msra.mxu1 %v1481_v39  ;;  %1460 = vmatprep.subr.bf16.mxu0 %v1459_v40  ;;  %v255_v61 = vld [vmem:[%s2328_s2 + $0x158] sm:$0xff]  ;;  %v1465_v63 = vpack.c.bf16 %v248_v55, %v244_v54  ;;  %v1489_v0 = vpack.c.bf16 %v250_v58, %v246_v56  ;;  %v1467_v1 = vpack.c.bf16 %v257_v60, %v253_v59  ;;  %v252_v2 = vld [vmem:[%s2328_s2 + $0x140] sm:$0xff]  ;;  %v254_v5 = vld [vmem:[%s2328_s2 + $0x150] sm:$0xff]  ;;  %p1580_p13 = pnand %p1579_p12, %p1722_p4 }
  0x1d   : > { %1484 = vmatprep.subr.bf16.mxu1 %v1483_v44  ;;  %v259_v62 = vld [vmem:[%s2328_s2 + $0x178] sm:$0xff]  ;;  %v256_v3 = vld [vmem:[%s2328_s2 + $0x160] sm:$0xff]  ;;  %v258_v6 = vld [vmem:[%s2328_s2 + $0x170] sm:$0xff]  ;;  %p1587_p3 = por %p1586_p2, %p1585_p1 }
  0x1e   : > { %v1491_v4 = vpack.c.bf16 %v259_v62, %v255_v61  ;;  %v1469_v8 = vpack.c.bf16 %v256_v3, %v252_v2  ;;  %v1493_v9 = vpack.c.bf16 %v258_v6, %v254_v5  ;;  %v206_v10 = vld [vmem:[%s198_s23] sm:$0xff]  ;;  %v207_v11 = vld [vmem:[%s198_s23 + $0x8] sm:$0xff]  ;;  %v208_v12 = vld [vmem:[%s198_s23 + $0x10] sm:$0xff]  ;;  %p1581_p0 = pneg %p1580_p13 }
  0x1f   : > { %1462 = vmatpush1.bf16.msra.mxu0 %v1461_v51  ;;  %v209_v13 = vld [vmem:[%s198_s23 + $0x18] sm:$0xff]  ;;  %v210_v14 = vld [vmem:[%s198_s23 + $0x20] sm:$0xff]  ;;  %v211_v15 = vld [vmem:[%s198_s23 + $0x28] sm:$0xff]  ;;  %s1446_s23 = sshll.u32 %s1648_s15, 14  ;;  %s2280_s15 = scalar_lea.sflag [#allocation3], %s191_s18 }
  0x20   : > { %1486 = vmatpush1.bf16.msra.mxu1 %v1485_v52  ;;  %1464 = vmatprep.subr.bf16.mxu0 %v1463_v53  ;;  %v481_v52 = vld [vmem:[%s2327_s1] sm:$0xff]  ;;  %v482_v53 = vld [vmem:[%s2327_s1 + $0x8] sm:$0xff]  ;;  %v483_v54 = vld [vmem:[%s2327_s1 + $0x10] sm:$0xff]  ;;  %s2270_s28 = scalar_lea.hbm %s2329_s3, %s1446_s23  ;;  %p1588_p5 = pnand %p1587_p3, %p1581_p0 }
  0x21   : > { %1488 = vmatprep.subr.bf16.mxu1 %v1487_v57  ;;  %v484_v55 = vld [vmem:[%s2327_s1 + $0x18] sm:$0xff]  ;;  %v485_v56 = vld [vmem:[%s2327_s1 + $0x20] sm:$0xff]  ;;  %v486_v57 = vld [vmem:[%s2327_s1 + $0x28] sm:$0xff] }
  0x22   : > { %v487_v58 = vld [vmem:[%s2327_s1 + $0x30] sm:$0xff]  ;;  %v488_v59 = vld [vmem:[%s2327_s1 + $0x38] sm:$0xff]  ;;  %v489_v60 = vld [vmem:[%s2327_s1 + $0x40] sm:$0xff] }
  0x23   : > { %1466 = vmatpush1.bf16.msra.mxu0 %v1465_v63  ;;  %v490_v61 = vld [vmem:[%s2327_s1 + $0x48] sm:$0xff]  ;;  %v491_v62 = vld [vmem:[%s2327_s1 + $0x50] sm:$0xff]  ;;  %v492_v63 = vld [vmem:[%s2327_s1 + $0x58] sm:$0xff] }
  0x24   : > { %1490 = vmatpush1.bf16.msra.mxu1 %v1489_v0  ;;  %1468 = vmatprep.subr.bf16.mxu0 %v1467_v1  ;;  %v493_v0 = vld [vmem:[%s2327_s1 + $0x60] sm:$0xff]  ;;  %v494_v1 = vld [vmem:[%s2327_s1 + $0x68] sm:$0xff]  ;;  %v495_v2 = vld [vmem:[%s2327_s1 + $0x70] sm:$0xff] }
  0x25   : > { %1492 = vmatprep.subr.bf16.mxu1 %v1491_v4  ;;  %v496_v3 = vld [vmem:[%s2327_s1 + $0x78] sm:$0xff]  ;;  %v497_v4 = vld [vmem:[%s2327_s1 + $0x80] sm:$0xff]  ;;  %v498_v5 = vld [vmem:[%s2327_s1 + $0x88] sm:$0xff] }
  0x26   : > { %v499_v6 = vld [vmem:[%s2327_s1 + $0x90] sm:$0xff] }
  0x27   : > { %1470 = vmatpush1.bf16.msra.mxu0 %v1469_v8  ;;  %v500_v8 = vld [vmem:[%s2327_s1 + $0x98] sm:$0xff] }
  0x28   : > { %1494 = vmatpush1.bf16.msra.mxu1 %v1493_v9  ;;  %v501_v9 = vld [vmem:[%s2327_s1 + $0xa0] sm:$0xff] }
  0x2a   : > { %1365 = vmatmul.mubr.msk.f32.vlgmr.msra.gmra.mrb[0].mxu0 %vm260_vm0, %v206_v10 }
  0x2b   : > { %1371 = vmatmul.mubr.msk.f32.vlgmr.msra.gmra.mrb[0].mxu1 %vm260_vm0, %v206_v10  ;;  %349 = vmatprep.mubr.f32.mxu0 %v1658_v7  ;;  %v502_v10 = vld [vmem:[%s2327_s1 + $0xa8] sm:$0xff] }
  0x2c   : > { %450 = vmatprep.mubr.f32.mxu1 %v1658_v7 }
  0x2e   : > { %1366 = vmatmul.mubr.msk.f32.gmra.mrb[2].mxu0 %vm260_vm0, %v207_v11 }
  0x2f   : > { %1372 = vmatmul.mubr.msk.f32.gmra.mrb[2].mxu1 %vm260_vm0, %v207_v11  ;;  %355 = vmatprep.mubr.f32.mxu0 %v1658_v7  ;;  %v503_v11 = vld [vmem:[%s2327_s1 + $0xb0] sm:$0xff] }
  0x30   : > { %456 = vmatprep.mubr.f32.mxu1 %v1658_v7 }
  0x32   : > { %1367 = vmatmul.mubr.msk.f32.gmra.mrb[4].mxu0 %vm260_vm0, %v208_v12 }
  0x33   : > { %1373 = vmatmul.mubr.msk.f32.gmra.mrb[4].mxu1 %vm260_vm0, %v208_v12  ;;  %361 = vmatprep.mubr.f32.mxu0 %v1658_v7  ;;  %v504_v12 = vld [vmem:[%s2327_s1 + $0xb8] sm:$0xff] }
  0x34   : > { %462 = vmatprep.mubr.f32.mxu1 %v1658_v7 }
  0x36   : > { %1368 = vmatmul.mubr.msk.f32.gmra.mrb[6].mxu0 %vm260_vm0, %v209_v13 }
  0x37   : > { %1374 = vmatmul.mubr.msk.f32.gmra.mrb[6].mxu1 %vm260_vm0, %v209_v13  ;;  %367 = vmatprep.mubr.f32.mxu0 %v1658_v7  ;;  %v505_v13 = vld [vmem:[%s2327_s1 + $0xc0] sm:$0xff] }
  0x38   : > { %468 = vmatprep.mubr.f32.mxu1 %v1658_v7 }
  0x3a   : > { %1369 = vmatmul.mubr.msk.f32.gmra.mrb[8].mxu0 %vm260_vm0, %v210_v14 }
  0x3b   : > { %1375 = vmatmul.mubr.msk.f32.gmra.mrb[8].mxu1 %vm260_vm0, %v210_v14  ;;  %373 = vmatprep.mubr.f32.mxu0 %v1658_v7  ;;  %v506_v14 = vld [vmem:[%s2327_s1 + $0xc8] sm:$0xff] }
  0x3c   : > { %474 = vmatprep.mubr.f32.mxu1 %v1658_v7 }
  0x3e   : > { %1370 = vmatmul.mubr.msk.f32.gmra.mrb[10].mxu0 %vm260_vm0, %v211_v15 }
  0x3f   : > { %1376 = vmatmul.mubr.msk.f32.gmra.mrb[10].mxu1 %vm260_vm0, %v211_v15  ;;  %674 = vmatprep.mubr.f32.mxu0 %v1658_v7  ;;  %v507_v15 = vld [vmem:[%s2327_s1 + $0xd0] sm:$0xff] }
  0x40   : > { %931 = vmatprep.mubr.f32.mxu1 %v1658_v7 }
  0xfd   : > { %v345_v16 = vpop.f32.mrb[0].mxu0 }
  0xfe   : > { %v446_v17 = vpop.f32.mrb[0].mxu1  ;;  %v347_v18 = vpop.f32.mrb[1].mxu0 }
  0xff   : > { %v448_v19 = vpop.f32.mrb[1].mxu1 }
 0x101   : > { %v351_v20 = vpop.f32.mrb[2].mxu0 }
 0x102   : > { %v1497_v21 = vpack.c.bf16 %v351_v20, %v345_v16  ;;  %v452_v22 = vpop.f32.mrb[2].mxu1  ;;  %v353_v23 = vpop.f32.mrb[3].mxu0  ;;  %v508_v16 = vld [vmem:[%s2327_s1 + $0xd8] sm:$0xff] }
 0x103   : > { %v1509_v24 = vpack.c.bf16 %v452_v22, %v446_v17  ;;  %v1495_v25 = vpack.c.bf16 %v353_v23, %v347_v18  ;;  %v454_v26 = vpop.f32.mrb[3].mxu1  ;;  %v509_v17 = vld [vmem:[%s2327_s1 + $0xe0] sm:$0xff]  ;;  %v510_v18 = vld [vmem:[%s2327_s1 + $0xe8] sm:$0xff]  ;;  %v512_v20 = vld [vmem:[%s2327_s1 + $0xf8] sm:$0xff] }
 0x104   : > { %v1507_v27 = vpack.c.bf16 %v454_v26, %v448_v19  ;;  %v511_v19 = vld [vmem:[%s2327_s1 + $0xf0] sm:$0xff] }
 0x105   : > { %v357_v28 = vpop.f32.mrb[4].mxu0  ;;  %1496 = vmatprep.subr.bf16.mxu0 %v1495_v25 }
 0x106   : > { %v458_v29 = vpop.f32.mrb[4].mxu1  ;;  %1508 = vmatprep.subr.bf16.mxu1 %v1507_v27  ;;  %v359_v30 = vpop.f32.mrb[5].mxu0  ;;  %1498 = vmatpush1.bf16.msra.mxu0 %v1497_v21 }
 0x107   : > { %v460_v31 = vpop.f32.mrb[5].mxu1  ;;  %1510 = vmatpush1.bf16.msra.mxu1 %v1509_v24 }
 0x109   : > { %v363_v32 = vpop.f32.mrb[6].mxu0 }
 0x10a   : > { %v1501_v33 = vpack.c.bf16 %v363_v32, %v357_v28  ;;  %v464_v34 = vpop.f32.mrb[6].mxu1  ;;  %v365_v35 = vpop.f32.mrb[7].mxu0 }
 0x10b   : > { %v1513_v36 = vpack.c.bf16 %v464_v34, %v458_v29  ;;  %v1499_v37 = vpack.c.bf16 %v365_v35, %v359_v30  ;;  %v466_v38 = vpop.f32.mrb[7].mxu1 }
 0x10c   : > { %v1511_v39 = vpack.c.bf16 %v466_v38, %v460_v31 }
 0x10d   : > { %v369_v40 = vpop.f32.mrb[8].mxu0  ;;  %1500 = vmatprep.subr.bf16.mxu0 %v1499_v37 }
 0x10e   : > { %v470_v41 = vpop.f32.mrb[8].mxu1  ;;  %1512 = vmatprep.subr.bf16.mxu1 %v1511_v39  ;;  %v371_v42 = vpop.f32.mrb[9].mxu0  ;;  %1502 = vmatpush1.bf16.msra.mxu0 %v1501_v33 }
 0x10f   : > { %v472_v43 = vpop.f32.mrb[9].mxu1  ;;  %1514 = vmatpush1.bf16.msra.mxu1 %v1513_v36 }
 0x111   : > { %v375_v44 = vpop.f32.mrb[10].mxu0 }
 0x112   : > { %v1505_v45 = vpack.c.bf16 %v375_v44, %v369_v40  ;;  %v476_v46 = vpop.f32.mrb[10].mxu1  ;;  %v377_v47 = vpop.f32.mrb[11].mxu0 }
 0x113   : > { %v1517_v48 = vpack.c.bf16 %v476_v46, %v470_v41  ;;  %v1503_v49 = vpack.c.bf16 %v377_v47, %v371_v42  ;;  %v478_v50 = vpop.f32.mrb[11].mxu1 }
 0x114   : > { %v1515_v51 = vpack.c.bf16 %v478_v50, %v472_v43 }
 0x115   : > { %1504 = vmatprep.subr.bf16.mxu0 %v1503_v49 }
 0x116   : > { %1516 = vmatprep.subr.bf16.mxu1 %v1515_v51  ;;  %1506 = vmatpush1.bf16.msra.mxu0 %v1505_v45 }
 0x117   : > { %1518 = vmatpush1.bf16.msra.mxu1 %v1517_v48 }
 0x119   : > { %1377 = vmatmul.mubr.msk.f32.vlgmr.msra.gmra.mrb[12].mxu0 %vm513_vm1, %v481_v52 }
 0x11a   : > { %1409 = vmatmul.mubr.msk.f32.vlgmr.msra.gmra.mrb[12].mxu1 %vm513_vm1, %v481_v52  ;;  %680 = vmatprep.mubr.f32.mxu0 %v1658_v7 }
 0x11b   : > { %937 = vmatprep.mubr.f32.mxu1 %v1658_v7 }
 0x11d   : > { %1378 = vmatmul.mubr.msk.f32.gmra.mrb[14].mxu0 %vm513_vm1, %v482_v53 }
 0x11e   : > { %1410 = vmatmul.mubr.msk.f32.gmra.mrb[14].mxu1 %vm513_vm1, %v482_v53  ;;  %686 = vmatprep.mubr.f32.mxu0 %v1658_v7 }
 0x11f   : > { %943 = vmatprep.mubr.f32.mxu1 %v1658_v7 }
 0x121   : > { %1379 = vmatmul.mubr.msk.f32.gmra.mrb[16].mxu0 %vm513_vm1, %v483_v54 }
 0x122   : > { %1411 = vmatmul.mubr.msk.f32.gmra.mrb[16].mxu1 %vm513_vm1, %v483_v54  ;;  %692 = vmatprep.mubr.f32.mxu0 %v1658_v7 }
 0x123   : > { %949 = vmatprep.mubr.f32.mxu1 %v1658_v7 }
 0x125   : > { %1380 = vmatmul.mubr.msk.f32.gmra.mrb[18].mxu0 %vm513_vm1, %v484_v55 }
 0x126   : > { %1412 = vmatmul.mubr.msk.f32.gmra.mrb[18].mxu1 %vm513_vm1, %v484_v55  ;;  %698 = vmatprep.mubr.f32.mxu0 %v1658_v7 }
 0x127   : > { %955 = vmatprep.mubr.f32.mxu1 %v1658_v7 }
 0x129   : > { %1381 = vmatmul.mubr.msk.f32.gmra.mrb[20].mxu0 %vm513_vm1, %v485_v56 }
 0x12a   : > { %1413 = vmatmul.mubr.msk.f32.gmra.mrb[20].mxu1 %vm513_vm1, %v485_v56  ;;  %704 = vmatprep.mubr.f32.mxu0 %v1658_v7 }
 0x12b   : > { %961 = vmatprep.mubr.f32.mxu1 %v1658_v7 }
 0x12d   : > { %1382 = vmatmul.mubr.msk.f32.gmra.mrb[22].mxu0 %vm513_vm1, %v486_v57 }
 0x12e   : > { %1414 = vmatmul.mubr.msk.f32.gmra.mrb[22].mxu1 %vm513_vm1, %v486_v57  ;;  %710 = vmatprep.mubr.f32.mxu0 %v1658_v7 }
 0x12f   : > { %967 = vmatprep.mubr.f32.mxu1 %v1658_v7 }
 0x131   : > { %1383 = vmatmul.mubr.msk.f32.gmra.mrb[24].mxu0 %vm513_vm1, %v487_v58 }
 0x132   : > { %1415 = vmatmul.mubr.msk.f32.gmra.mrb[24].mxu1 %vm513_vm1, %v487_v58  ;;  %716 = vmatprep.mubr.f32.mxu0 %v1658_v7 }
 0x133   : > { %973 = vmatprep.mubr.f32.mxu1 %v1658_v7 }
 0x135   : > { %1384 = vmatmul.mubr.msk.f32.gmra.mrb[26].mxu0 %vm513_vm1, %v488_v59 }
 0x136   : > { %1416 = vmatmul.mubr.msk.f32.gmra.mrb[26].mxu1 %vm513_vm1, %v488_v59  ;;  %722 = vmatprep.mubr.f32.mxu0 %v1658_v7 }
 0x137   : > { %979 = vmatprep.mubr.f32.mxu1 %v1658_v7 }
 0x139   : > { %1385 = vmatmul.mubr.msk.f32.gmra.mrb[28].mxu0 %vm513_vm1, %v489_v60 }
 0x13a   : > { %1417 = vmatmul.mubr.msk.f32.gmra.mrb[28].mxu1 %vm513_vm1, %v489_v60  ;;  %728 = vmatprep.mubr.f32.mxu0 %v1658_v7 }
 0x13b   : > { %985 = vmatprep.mubr.f32.mxu1 %v1658_v7 }
 0x13d   : > { %1386 = vmatmul.mubr.msk.f32.gmra.mrb[30].mxu0 %vm513_vm1, %v490_v61 }
 0x13e   : > { %1418 = vmatmul.mubr.msk.f32.gmra.mrb[30].mxu1 %vm513_vm1, %v490_v61  ;;  %734 = vmatprep.mubr.f32.mxu0 %v1658_v7 }
 0x13f   : > { %991 = vmatprep.mubr.f32.mxu1 %v1658_v7 }
 0x141   : > { %1387 = vmatmul.mubr.msk.f32.gmra.mrb[32].mxu0 %vm513_vm1, %v491_v62 }
 0x142   : > { %1419 = vmatmul.mubr.msk.f32.gmra.mrb[32].mxu1 %vm513_vm1, %v491_v62  ;;  %740 = vmatprep.mubr.f32.mxu0 %v1658_v7 }
 0x143   : > { %997 = vmatprep.mubr.f32.mxu1 %v1658_v7 }
 0x145   : > { %1388 = vmatmul.mubr.msk.f32.gmra.mrb[34].mxu0 %vm513_vm1, %v492_v63 }
 0x146   : > { %1420 = vmatmul.mubr.msk.f32.gmra.mrb[34].mxu1 %vm513_vm1, %v492_v63  ;;  %746 = vmatprep.mubr.f32.mxu0 %v1658_v7 }
 0x147   : > { %1003 = vmatprep.mubr.f32.mxu1 %v1658_v7 }
 0x149   : > { %1389 = vmatmul.mubr.msk.f32.gmra.mrb[36].mxu0 %vm513_vm1, %v493_v0 }
 0x14a   : > { %1421 = vmatmul.mubr.msk.f32.gmra.mrb[36].mxu1 %vm513_vm1, %v493_v0  ;;  %752 = vmatprep.mubr.f32.mxu0 %v1658_v7 }
 0x14b   : > { %1009 = vmatprep.mubr.f32.mxu1 %v1658_v7 }
 0x14d   : > { %1390 = vmatmul.mubr.msk.f32.gmra.mrb[38].mxu0 %vm513_vm1, %v494_v1 }
 0x14e   : > { %1422 = vmatmul.mubr.msk.f32.gmra.mrb[38].mxu1 %vm513_vm1, %v494_v1  ;;  %758 = vmatprep.mubr.f32.mxu0 %v1658_v7 }
 0x14f   : > { %1015 = vmatprep.mubr.f32.mxu1 %v1658_v7 }
 0x151   : > { %1391 = vmatmul.mubr.msk.f32.gmra.mrb[40].mxu0 %vm513_vm1, %v495_v2 }
 0x152   : > { %1423 = vmatmul.mubr.msk.f32.gmra.mrb[40].mxu1 %vm513_vm1, %v495_v2  ;;  %764 = vmatprep.mubr.f32.mxu0 %v1658_v7 }
 0x153   : > { %1021 = vmatprep.mubr.f32.mxu1 %v1658_v7 }
 0x155   : > { %1392 = vmatmul.mubr.msk.f32.gmra.mrb[42].mxu0 %vm513_vm1, %v496_v3 }
 0x156   : > { %1424 = vmatmul.mubr.msk.f32.gmra.mrb[42].mxu1 %vm513_vm1, %v496_v3  ;;  %770 = vmatprep.mubr.f32.mxu0 %v1658_v7 }
 0x157   : > { %1027 = vmatprep.mubr.f32.mxu1 %v1658_v7 }
 0x159   : > { %1393 = vmatmul.mubr.msk.f32.gmra.mrb[44].mxu0 %vm513_vm1, %v497_v4 }
 0x15a   : > { %1425 = vmatmul.mubr.msk.f32.gmra.mrb[44].mxu1 %vm513_vm1, %v497_v4  ;;  %776 = vmatprep.mubr.f32.mxu0 %v1658_v7 }
 0x15b   : > { %1033 = vmatprep.mubr.f32.mxu1 %v1658_v7 }
 0x15d   : > { %1394 = vmatmul.mubr.msk.f32.gmra.mrb[46].mxu0 %vm513_vm1, %v498_v5 }
 0x15e   : > { %1426 = vmatmul.mubr.msk.f32.gmra.mrb[46].mxu1 %vm513_vm1, %v498_v5  ;;  %782 = vmatprep.mubr.f32.mxu0 %v1658_v7 }
 0x15f   : > { %1039 = vmatprep.mubr.f32.mxu1 %v1658_v7 }
 0x161   : > { %1395 = vmatmul.mubr.msk.f32.gmra.mrb[48].mxu0 %vm513_vm1, %v499_v6 }
 0x162   : > { %1427 = vmatmul.mubr.msk.f32.gmra.mrb[48].mxu1 %vm513_vm1, %v499_v6  ;;  %788 = vmatprep.mubr.f32.mxu0 %v1658_v7 }
 0x163   : > { %1045 = vmatprep.mubr.f32.mxu1 %v1658_v7 }
 0x165   : > { %1396 = vmatmul.mubr.msk.f32.gmra.mrb[50].mxu0 %vm513_vm1, %v500_v8 }
 0x166   : > { %1428 = vmatmul.mubr.msk.f32.gmra.mrb[50].mxu1 %vm513_vm1, %v500_v8  ;;  %794 = vmatprep.mubr.f32.mxu0 %v1658_v7 }
 0x167   : > { %1051 = vmatprep.mubr.f32.mxu1 %v1658_v7 }
 0x169   : > { %1397 = vmatmul.mubr.msk.f32.gmra.mrb[52].mxu0 %vm513_vm1, %v501_v9 }
 0x16a   : > { %1429 = vmatmul.mubr.msk.f32.gmra.mrb[52].mxu1 %vm513_vm1, %v501_v9  ;;  %800 = vmatprep.mubr.f32.mxu0 %v1658_v7 }
 0x16b   : > { %1057 = vmatprep.mubr.f32.mxu1 %v1658_v7 }
 0x16d   : > { %1398 = vmatmul.mubr.msk.f32.gmra.mrb[54].mxu0 %vm513_vm1, %v502_v10 }
 0x16e   : > { %1430 = vmatmul.mubr.msk.f32.gmra.mrb[54].mxu1 %vm513_vm1, %v502_v10  ;;  %806 = vmatprep.mubr.f32.mxu0 %v1658_v7 }
 0x16f   : > { %1063 = vmatprep.mubr.f32.mxu1 %v1658_v7 }
 0x171   : > { %1399 = vmatmul.mubr.msk.f32.gmra.mrb[56].mxu0 %vm513_vm1, %v503_v11 }
 0x172   : > { %1431 = vmatmul.mubr.msk.f32.gmra.mrb[56].mxu1 %vm513_vm1, %v503_v11  ;;  %812 = vmatprep.mubr.f32.mxu0 %v1658_v7 }
 0x173   : > { %1069 = vmatprep.mubr.f32.mxu1 %v1658_v7 }
 0x175   : > { %1400 = vmatmul.mubr.msk.f32.gmra.mrb[58].mxu0 %vm513_vm1, %v504_v12 }
 0x176   : > { %1432 = vmatmul.mubr.msk.f32.gmra.mrb[58].mxu1 %vm513_vm1, %v504_v12  ;;  %818 = vmatprep.mubr.f32.mxu0 %v1658_v7 }
 0x177   : > { %1075 = vmatprep.mubr.f32.mxu1 %v1658_v7 }
 0x179   : > { %1401 = vmatmul.mubr.msk.f32.gmra.mrb[60].mxu0 %vm513_vm1, %v505_v13 }
 0x17a   : > { %1433 = vmatmul.mubr.msk.f32.gmra.mrb[60].mxu1 %vm513_vm1, %v505_v13  ;;  %824 = vmatprep.mubr.f32.mxu0 %v1658_v7 }
 0x17b   : > { %1081 = vmatprep.mubr.f32.mxu1 %v1658_v7 }
 0x17d   : > { %1402 = vmatmul.mubr.msk.f32.gmra.mrb[62].mxu0 %vm513_vm1, %v506_v14 }
 0x17e   : > { %1434 = vmatmul.mubr.msk.f32.gmra.mrb[62].mxu1 %vm513_vm1, %v506_v14  ;;  %830 = vmatprep.mubr.f32.mxu0 %v1658_v7 }
 0x17f   : > { %1087 = vmatprep.mubr.f32.mxu1 %v1658_v7 }
 0x181   : > { %1403 = vmatmul.mubr.msk.f32.gmra.mrb[64].mxu0 %vm513_vm1, %v507_v15 }
 0x182   : > { %1435 = vmatmul.mubr.msk.f32.gmra.mrb[64].mxu1 %vm513_vm1, %v507_v15  ;;  %836 = vmatprep.mubr.f32.mxu0 %v1658_v7 }
 0x183   : > { %1093 = vmatprep.mubr.f32.mxu1 %v1658_v7 }
 0x185   : > { %1404 = vmatmul.mubr.msk.f32.gmra.mrb[66].mxu0 %vm513_vm1, %v508_v16 }
 0x186   : > { %1436 = vmatmul.mubr.msk.f32.gmra.mrb[66].mxu1 %vm513_vm1, %v508_v16  ;;  %842 = vmatprep.mubr.f32.mxu0 %v1658_v7 }
 0x187   : > { %1099 = vmatprep.mubr.f32.mxu1 %v1658_v7 }
 0x189   : > { %1405 = vmatmul.mubr.msk.f32.gmra.mrb[68].mxu0 %vm513_vm1, %v509_v17 }
 0x18a   : > { %1437 = vmatmul.mubr.msk.f32.gmra.mrb[68].mxu1 %vm513_vm1, %v509_v17  ;;  %848 = vmatprep.mubr.f32.mxu0 %v1658_v7 }
 0x18b   : > { %1105 = vmatprep.mubr.f32.mxu1 %v1658_v7 }
 0x18d   : > { %1406 = vmatmul.mubr.msk.f32.gmra.mrb[70].mxu0 %vm513_vm1, %v510_v18 }
 0x18e   : > { %1438 = vmatmul.mubr.msk.f32.gmra.mrb[70].mxu1 %vm513_vm1, %v510_v18  ;;  %854 = vmatprep.mubr.f32.mxu0 %v1658_v7 }
 0x18f   : > { %1111 = vmatprep.mubr.f32.mxu1 %v1658_v7 }
 0x191   : > { %1407 = vmatmul.mubr.msk.f32.gmra.mrb[72].mxu0 %vm513_vm1, %v511_v19 }
 0x192   : > { %1439 = vmatmul.mubr.msk.f32.gmra.mrb[72].mxu1 %vm513_vm1, %v511_v19  ;;  %860 = vmatprep.mubr.f32.mxu0 %v1658_v7 }
 0x193   : > { %1117 = vmatprep.mubr.f32.mxu1 %v1658_v7 }
 0x195   : > { %1408 = vmatmul.mubr.msk.f32.gmra.mrb[74].mxu0 %vm513_vm1, %v512_v20 }
 0x196   : > { %1440 = vmatmul.mubr.msk.f32.gmra.mrb[74].mxu1 %vm513_vm1, %v512_v20 }
 0x1ec   : > { %v676_v21 = vpop.f32.mrb[12].mxu0 }
 0x1ed   : > { %1124 = vst [vmem:[%s2139_s21] sm:$0xff] %v676_v21  ;;  %v933_v7 = vpop.f32.mrb[12].mxu1  ;;  %v678_v22 = vpop.f32.mrb[13].mxu0 }
 0x1ee   : > { %1126 = vst [vmem:[%s2139_s21 + $0x10] sm:$0xff] %v933_v7  ;;  %1125 = vst [vmem:[%s2139_s21 + $0x8] sm:$0xff] %v678_v22  ;;  %v935_v23 = vpop.f32.mrb[13].mxu1 }
 0x1ef   : > { %1127 = vst [vmem:[%s2139_s21 + $0x18] sm:$0xff] %v935_v23 }
 0x1f0   : > { %v682_v24 = vpop.f32.mrb[14].mxu0 }
 0x1f1   : > { %1128 = vst [vmem:[%s2139_s21 + $0x20] sm:$0xff] %v682_v24  ;;  %v939_v25 = vpop.f32.mrb[14].mxu1  ;;  %v684_v26 = vpop.f32.mrb[15].mxu0 }
 0x1f2   : > { %1130 = vst [vmem:[%s2139_s21 + $0x30] sm:$0xff] %v939_v25  ;;  %1129 = vst [vmem:[%s2139_s21 + $0x28] sm:$0xff] %v684_v26  ;;  %v941_v27 = vpop.f32.mrb[15].mxu1 }
 0x1f3   : > { %1131 = vst [vmem:[%s2139_s21 + $0x38] sm:$0xff] %v941_v27 }
 0x1f4   : > { %v688_v28 = vpop.f32.mrb[16].mxu0 }
 0x1f5   : > { %1132 = vst [vmem:[%s2139_s21 + $0x40] sm:$0xff] %v688_v28  ;;  %v945_v29 = vpop.f32.mrb[16].mxu1  ;;  %v690_v30 = vpop.f32.mrb[17].mxu0 }
 0x1f6   : > { %1134 = vst [vmem:[%s2139_s21 + $0x50] sm:$0xff] %v945_v29  ;;  %1133 = vst [vmem:[%s2139_s21 + $0x48] sm:$0xff] %v690_v30  ;;  %v947_v31 = vpop.f32.mrb[17].mxu1 }
 0x1f7   : > { %1135 = vst [vmem:[%s2139_s21 + $0x58] sm:$0xff] %v947_v31 }
 0x1f8   : > { %v694_v32 = vpop.f32.mrb[18].mxu0 }
 0x1f9   : > { %1136 = vst [vmem:[%s2139_s21 + $0x60] sm:$0xff] %v694_v32  ;;  %v951_v33 = vpop.f32.mrb[18].mxu1  ;;  %v696_v34 = vpop.f32.mrb[19].mxu0 }
 0x1fa   : > { %1138 = vst [vmem:[%s2139_s21 + $0x70] sm:$0xff] %v951_v33  ;;  %1137 = vst [vmem:[%s2139_s21 + $0x68] sm:$0xff] %v696_v34  ;;  %v953_v35 = vpop.f32.mrb[19].mxu1 }
 0x1fb   : > { %1139 = vst [vmem:[%s2139_s21 + $0x78] sm:$0xff] %v953_v35 }
 0x1fc   : > { %v700_v36 = vpop.f32.mrb[20].mxu0 }
 0x1fd   : > { %1140 = vst [vmem:[%s2139_s21 + $0x80] sm:$0xff] %v700_v36  ;;  %v957_v37 = vpop.f32.mrb[20].mxu1  ;;  %v702_v38 = vpop.f32.mrb[21].mxu0 }
 0x1fe   : > { %1142 = vst [vmem:[%s2139_s21 + $0x90] sm:$0xff] %v957_v37  ;;  %1141 = vst [vmem:[%s2139_s21 + $0x88] sm:$0xff] %v702_v38  ;;  %v959_v39 = vpop.f32.mrb[21].mxu1 }
 0x1ff   : > { %1143 = vst [vmem:[%s2139_s21 + $0x98] sm:$0xff] %v959_v39 }
 0x200   : > { %v706_v40 = vpop.f32.mrb[22].mxu0 }
 0x201   : > { %1144 = vst [vmem:[%s2139_s21 + $0xa0] sm:$0xff] %v706_v40  ;;  %v963_v41 = vpop.f32.mrb[22].mxu1  ;;  %v708_v42 = vpop.f32.mrb[23].mxu0 }
 0x202   : > { %1146 = vst [vmem:[%s2139_s21 + $0xb0] sm:$0xff] %v963_v41  ;;  %1145 = vst [vmem:[%s2139_s21 + $0xa8] sm:$0xff] %v708_v42  ;;  %v965_v43 = vpop.f32.mrb[23].mxu1 }
 0x203   : > { %1147 = vst [vmem:[%s2139_s21 + $0xb8] sm:$0xff] %v965_v43 }
 0x204   : > { %v712_v44 = vpop.f32.mrb[24].mxu0 }
 0x205   : > { %1148 = vst [vmem:[%s2139_s21 + $0xc0] sm:$0xff] %v712_v44  ;;  %v969_v45 = vpop.f32.mrb[24].mxu1  ;;  %v714_v46 = vpop.f32.mrb[25].mxu0 }
 0x206   : > { %1150 = vst [vmem:[%s2139_s21 + $0xd0] sm:$0xff] %v969_v45  ;;  %1149 = vst [vmem:[%s2139_s21 + $0xc8] sm:$0xff] %v714_v46  ;;  %v971_v47 = vpop.f32.mrb[25].mxu1 }
 0x207   : > { %1151 = vst [vmem:[%s2139_s21 + $0xd8] sm:$0xff] %v971_v47 }
 0x208   : > { %v718_v48 = vpop.f32.mrb[26].mxu0 }
 0x209   : > { %1152 = vst [vmem:[%s2139_s21 + $0xe0] sm:$0xff] %v718_v48  ;;  %v975_v49 = vpop.f32.mrb[26].mxu1  ;;  %v720_v50 = vpop.f32.mrb[27].mxu0 }
 0x20a   : > { %1154 = vst [vmem:[%s2139_s21 + $0xf0] sm:$0xff] %v975_v49  ;;  %1153 = vst [vmem:[%s2139_s21 + $0xe8] sm:$0xff] %v720_v50  ;;  %v977_v51 = vpop.f32.mrb[27].mxu1 }
 0x20b   : > { %1155 = vst [vmem:[%s2139_s21 + $0xf8] sm:$0xff] %v977_v51 }
 0x20c   : > { %v724_v52 = vpop.f32.mrb[28].mxu0 }
 0x20d   : > { %1156 = vst [vmem:[%s2139_s21 + $0x100] sm:$0xff] %v724_v52  ;;  %v981_v53 = vpop.f32.mrb[28].mxu1  ;;  %v726_v54 = vpop.f32.mrb[29].mxu0 }
 0x20e   : > { %1158 = vst [vmem:[%s2139_s21 + $0x110] sm:$0xff] %v981_v53  ;;  %1157 = vst [vmem:[%s2139_s21 + $0x108] sm:$0xff] %v726_v54  ;;  %v983_v55 = vpop.f32.mrb[29].mxu1 }
 0x20f   : > { %1159 = vst [vmem:[%s2139_s21 + $0x118] sm:$0xff] %v983_v55 }
 0x210   : > { %v730_v56 = vpop.f32.mrb[30].mxu0 }
 0x211   : > { %1160 = vst [vmem:[%s2139_s21 + $0x120] sm:$0xff] %v730_v56  ;;  %v987_v57 = vpop.f32.mrb[30].mxu1  ;;  %v732_v58 = vpop.f32.mrb[31].mxu0 }
 0x212   : > { %1162 = vst [vmem:[%s2139_s21 + $0x130] sm:$0xff] %v987_v57  ;;  %1161 = vst [vmem:[%s2139_s21 + $0x128] sm:$0xff] %v732_v58  ;;  %v989_v59 = vpop.f32.mrb[31].mxu1 }
 0x213   : > { %1163 = vst [vmem:[%s2139_s21 + $0x138] sm:$0xff] %v989_v59 }
 0x214   : > { %v736_v60 = vpop.f32.mrb[32].mxu0 }
 0x215   : > { %1164 = vst [vmem:[%s2139_s21 + $0x140] sm:$0xff] %v736_v60  ;;  %v993_v61 = vpop.f32.mrb[32].mxu1  ;;  %v738_v62 = vpop.f32.mrb[33].mxu0 }
 0x216   : > { %1166 = vst [vmem:[%s2139_s21 + $0x150] sm:$0xff] %v993_v61  ;;  %1165 = vst [vmem:[%s2139_s21 + $0x148] sm:$0xff] %v738_v62  ;;  %v995_v63 = vpop.f32.mrb[33].mxu1 }
 0x217   : > { %1167 = vst [vmem:[%s2139_s21 + $0x158] sm:$0xff] %v995_v63 }
 0x218   : > { %v742_v0 = vpop.f32.mrb[34].mxu0 }
 0x219   : > { %1168 = vst [vmem:[%s2139_s21 + $0x160] sm:$0xff] %v742_v0  ;;  %v999_v1 = vpop.f32.mrb[34].mxu1  ;;  %v744_v2 = vpop.f32.mrb[35].mxu0 }
 0x21a   : > { %1170 = vst [vmem:[%s2139_s21 + $0x170] sm:$0xff] %v999_v1  ;;  %1169 = vst [vmem:[%s2139_s21 + $0x168] sm:$0xff] %v744_v2  ;;  %v1001_v3 = vpop.f32.mrb[35].mxu1 }
 0x21b   : > { %1171 = vst [vmem:[%s2139_s21 + $0x178] sm:$0xff] %v1001_v3 }
 0x21c   : > { %v748_v4 = vpop.f32.mrb[36].mxu0 }
 0x21d   : > { %1172 = vst [vmem:[%s2139_s21 + $0x180] sm:$0xff] %v748_v4  ;;  %v1005_v5 = vpop.f32.mrb[36].mxu1  ;;  %v750_v6 = vpop.f32.mrb[37].mxu0 }
 0x21e   : > { %1174 = vst [vmem:[%s2139_s21 + $0x190] sm:$0xff] %v1005_v5  ;;  %1173 = vst [vmem:[%s2139_s21 + $0x188] sm:$0xff] %v750_v6  ;;  %v1007_v8 = vpop.f32.mrb[37].mxu1 }
 0x21f   : > { %1175 = vst [vmem:[%s2139_s21 + $0x198] sm:$0xff] %v1007_v8 }
 0x220   : > { %v754_v9 = vpop.f32.mrb[38].mxu0 }
 0x221   : > { %1176 = vst [vmem:[%s2139_s21 + $0x1a0] sm:$0xff] %v754_v9  ;;  %v1011_v10 = vpop.f32.mrb[38].mxu1  ;;  %v756_v11 = vpop.f32.mrb[39].mxu0 }
 0x222   : > { %1178 = vst [vmem:[%s2139_s21 + $0x1b0] sm:$0xff] %v1011_v10  ;;  %1177 = vst [vmem:[%s2139_s21 + $0x1a8] sm:$0xff] %v756_v11  ;;  %v1013_v12 = vpop.f32.mrb[39].mxu1 }
 0x223   : > { %1179 = vst [vmem:[%s2139_s21 + $0x1b8] sm:$0xff] %v1013_v12 }
 0x224   : > { %v760_v13 = vpop.f32.mrb[40].mxu0 }
 0x225   : > { %1180 = vst [vmem:[%s2139_s21 + $0x1c0] sm:$0xff] %v760_v13  ;;  %v1017_v14 = vpop.f32.mrb[40].mxu1  ;;  %v762_v15 = vpop.f32.mrb[41].mxu0 }
 0x226   : > { %1182 = vst [vmem:[%s2139_s21 + $0x1d0] sm:$0xff] %v1017_v14  ;;  %1181 = vst [vmem:[%s2139_s21 + $0x1c8] sm:$0xff] %v762_v15  ;;  %v1019_v16 = vpop.f32.mrb[41].mxu1 }
 0x227   : > { %1183 = vst [vmem:[%s2139_s21 + $0x1d8] sm:$0xff] %v1019_v16 }
 0x228   : > { %v766_v17 = vpop.f32.mrb[42].mxu0 }
 0x229   : > { %1184 = vst [vmem:[%s2139_s21 + $0x1e0] sm:$0xff] %v766_v17  ;;  %v1023_v18 = vpop.f32.mrb[42].mxu1  ;;  %v768_v19 = vpop.f32.mrb[43].mxu0 }
 0x22a   : > { %1186 = vst [vmem:[%s2139_s21 + $0x1f0] sm:$0xff] %v1023_v18  ;;  %1185 = vst [vmem:[%s2139_s21 + $0x1e8] sm:$0xff] %v768_v19  ;;  %v1025_v20 = vpop.f32.mrb[43].mxu1 }
 0x22b   : > { %1187 = vst [vmem:[%s2139_s21 + $0x1f8] sm:$0xff] %v1025_v20 }
 0x22c   : > { %v772_v21 = vpop.f32.mrb[44].mxu0 }
 0x22d   : > { %1188 = vst [vmem:[%s2139_s21 + $0x200] sm:$0xff] %v772_v21  ;;  %v1029_v7 = vpop.f32.mrb[44].mxu1  ;;  %v774_v22 = vpop.f32.mrb[45].mxu0 }
 0x22e   : > { %1190 = vst [vmem:[%s2139_s21 + $0x210] sm:$0xff] %v1029_v7  ;;  %1189 = vst [vmem:[%s2139_s21 + $0x208] sm:$0xff] %v774_v22  ;;  %v1031_v23 = vpop.f32.mrb[45].mxu1 }
 0x22f   : > { %1191 = vst [vmem:[%s2139_s21 + $0x218] sm:$0xff] %v1031_v23 }
 0x230   : > { %v778_v24 = vpop.f32.mrb[46].mxu0 }
 0x231   : > { %1192 = vst [vmem:[%s2139_s21 + $0x220] sm:$0xff] %v778_v24  ;;  %v1035_v25 = vpop.f32.mrb[46].mxu1  ;;  %v780_v26 = vpop.f32.mrb[47].mxu0 }
 0x232   : > { %1194 = vst [vmem:[%s2139_s21 + $0x230] sm:$0xff] %v1035_v25  ;;  %1193 = vst [vmem:[%s2139_s21 + $0x228] sm:$0xff] %v780_v26  ;;  %v1037_v27 = vpop.f32.mrb[47].mxu1 }
 0x233   : > { %1195 = vst [vmem:[%s2139_s21 + $0x238] sm:$0xff] %v1037_v27 }
 0x234   : > { %v784_v28 = vpop.f32.mrb[48].mxu0 }
 0x235   : > { %1196 = vst [vmem:[%s2139_s21 + $0x240] sm:$0xff] %v784_v28  ;;  %v1041_v29 = vpop.f32.mrb[48].mxu1  ;;  %v786_v30 = vpop.f32.mrb[49].mxu0 }
 0x236   : > { %1198 = vst [vmem:[%s2139_s21 + $0x250] sm:$0xff] %v1041_v29  ;;  %1197 = vst [vmem:[%s2139_s21 + $0x248] sm:$0xff] %v786_v30  ;;  %v1043_v31 = vpop.f32.mrb[49].mxu1 }
 0x237   : > { %1199 = vst [vmem:[%s2139_s21 + $0x258] sm:$0xff] %v1043_v31 }
 0x238   : > { %v790_v32 = vpop.f32.mrb[50].mxu0 }
 0x239   : > { %1200 = vst [vmem:[%s2139_s21 + $0x260] sm:$0xff] %v790_v32  ;;  %v1047_v33 = vpop.f32.mrb[50].mxu1  ;;  %v792_v34 = vpop.f32.mrb[51].mxu0 }
 0x23a   : > { %1202 = vst [vmem:[%s2139_s21 + $0x270] sm:$0xff] %v1047_v33  ;;  %1201 = vst [vmem:[%s2139_s21 + $0x268] sm:$0xff] %v792_v34  ;;  %v1049_v35 = vpop.f32.mrb[51].mxu1 }
 0x23b   : > { %1203 = vst [vmem:[%s2139_s21 + $0x278] sm:$0xff] %v1049_v35 }
 0x23c   : > { %v796_v36 = vpop.f32.mrb[52].mxu0 }
 0x23d   : > { %1204 = vst [vmem:[%s2139_s21 + $0x280] sm:$0xff] %v796_v36  ;;  %v1053_v37 = vpop.f32.mrb[52].mxu1  ;;  %v798_v38 = vpop.f32.mrb[53].mxu0 }
 0x23e   : > { %1206 = vst [vmem:[%s2139_s21 + $0x290] sm:$0xff] %v1053_v37  ;;  %1205 = vst [vmem:[%s2139_s21 + $0x288] sm:$0xff] %v798_v38  ;;  %v1055_v39 = vpop.f32.mrb[53].mxu1 }
 0x23f   : > { %1207 = vst [vmem:[%s2139_s21 + $0x298] sm:$0xff] %v1055_v39 }
 0x240   : > { %v802_v40 = vpop.f32.mrb[54].mxu0 }
 0x241   : > { %1208 = vst [vmem:[%s2139_s21 + $0x2a0] sm:$0xff] %v802_v40  ;;  %v1059_v41 = vpop.f32.mrb[54].mxu1  ;;  %v804_v42 = vpop.f32.mrb[55].mxu0 }
 0x242   : > { %1210 = vst [vmem:[%s2139_s21 + $0x2b0] sm:$0xff] %v1059_v41  ;;  %1209 = vst [vmem:[%s2139_s21 + $0x2a8] sm:$0xff] %v804_v42  ;;  %v1061_v43 = vpop.f32.mrb[55].mxu1 }
 0x243   : > { %1211 = vst [vmem:[%s2139_s21 + $0x2b8] sm:$0xff] %v1061_v43 }
 0x244   : > { %v808_v44 = vpop.f32.mrb[56].mxu0 }
 0x245   : > { %1212 = vst [vmem:[%s2139_s21 + $0x2c0] sm:$0xff] %v808_v44  ;;  %v1065_v45 = vpop.f32.mrb[56].mxu1  ;;  %v810_v46 = vpop.f32.mrb[57].mxu0 }
 0x246   : > { %1214 = vst [vmem:[%s2139_s21 + $0x2d0] sm:$0xff] %v1065_v45  ;;  %1213 = vst [vmem:[%s2139_s21 + $0x2c8] sm:$0xff] %v810_v46  ;;  %v1067_v47 = vpop.f32.mrb[57].mxu1 }
 0x247   : > { %1215 = vst [vmem:[%s2139_s21 + $0x2d8] sm:$0xff] %v1067_v47 }
 0x248   : > { %v814_v48 = vpop.f32.mrb[58].mxu0 }
 0x249   : > { %1216 = vst [vmem:[%s2139_s21 + $0x2e0] sm:$0xff] %v814_v48  ;;  %v1071_v49 = vpop.f32.mrb[58].mxu1  ;;  %v816_v50 = vpop.f32.mrb[59].mxu0 }
 0x24a   : > { %1218 = vst [vmem:[%s2139_s21 + $0x2f0] sm:$0xff] %v1071_v49  ;;  %1217 = vst [vmem:[%s2139_s21 + $0x2e8] sm:$0xff] %v816_v50  ;;  %v1073_v51 = vpop.f32.mrb[59].mxu1 }
 0x24b   : > { %1219 = vst [vmem:[%s2139_s21 + $0x2f8] sm:$0xff] %v1073_v51 }
 0x24c   : > { %v820_v52 = vpop.f32.mrb[60].mxu0 }
 0x24d   : > { %1220 = vst [vmem:[%s2139_s21 + $0x300] sm:$0xff] %v820_v52  ;;  %v1077_v53 = vpop.f32.mrb[60].mxu1  ;;  %v822_v54 = vpop.f32.mrb[61].mxu0 }
 0x24e   : > { %1222 = vst [vmem:[%s2139_s21 + $0x310] sm:$0xff] %v1077_v53  ;;  %1221 = vst [vmem:[%s2139_s21 + $0x308] sm:$0xff] %v822_v54  ;;  %v1079_v55 = vpop.f32.mrb[61].mxu1 }
 0x24f   : > { %1223 = vst [vmem:[%s2139_s21 + $0x318] sm:$0xff] %v1079_v55 }
 0x250   : > { %v826_v56 = vpop.f32.mrb[62].mxu0 }
 0x251   : > { %1224 = vst [vmem:[%s2139_s21 + $0x320] sm:$0xff] %v826_v56  ;;  %v1083_v57 = vpop.f32.mrb[62].mxu1  ;;  %v828_v58 = vpop.f32.mrb[63].mxu0 }
 0x252   : > { %1226 = vst [vmem:[%s2139_s21 + $0x330] sm:$0xff] %v1083_v57  ;;  %1225 = vst [vmem:[%s2139_s21 + $0x328] sm:$0xff] %v828_v58  ;;  %v1085_v59 = vpop.f32.mrb[63].mxu1 }
 0x253   : > { %1227 = vst [vmem:[%s2139_s21 + $0x338] sm:$0xff] %v1085_v59 }
 0x254   : > { %v832_v60 = vpop.f32.mrb[64].mxu0 }
 0x255   : > { %1228 = vst [vmem:[%s2139_s21 + $0x340] sm:$0xff] %v832_v60  ;;  %v1089_v61 = vpop.f32.mrb[64].mxu1  ;;  %v834_v62 = vpop.f32.mrb[65].mxu0 }
 0x256   : > { %1230 = vst [vmem:[%s2139_s21 + $0x350] sm:$0xff] %v1089_v61  ;;  %1229 = vst [vmem:[%s2139_s21 + $0x348] sm:$0xff] %v834_v62  ;;  %v1091_v63 = vpop.f32.mrb[65].mxu1 }
 0x257   : > { %1231 = vst [vmem:[%s2139_s21 + $0x358] sm:$0xff] %v1091_v63 }
 0x258   : > { %v838_v0 = vpop.f32.mrb[66].mxu0 }
 0x259   : > { %1232 = vst [vmem:[%s2139_s21 + $0x360] sm:$0xff] %v838_v0  ;;  %v1095_v1 = vpop.f32.mrb[66].mxu1  ;;  %v840_v2 = vpop.f32.mrb[67].mxu0 }
 0x25a   : > { %1234 = vst [vmem:[%s2139_s21 + $0x370] sm:$0xff] %v1095_v1  ;;  %1233 = vst [vmem:[%s2139_s21 + $0x368] sm:$0xff] %v840_v2  ;;  %v1097_v3 = vpop.f32.mrb[67].mxu1 }
 0x25b   : > { %1235 = vst [vmem:[%s2139_s21 + $0x378] sm:$0xff] %v1097_v3 }
 0x25c   : > { %v844_v4 = vpop.f32.mrb[68].mxu0 }
 0x25d   : > { %1236 = vst [vmem:[%s2139_s21 + $0x380] sm:$0xff] %v844_v4  ;;  %v1101_v5 = vpop.f32.mrb[68].mxu1  ;;  %v846_v6 = vpop.f32.mrb[69].mxu0 }
 0x25e   : > { %1238 = vst [vmem:[%s2139_s21 + $0x390] sm:$0xff] %v1101_v5  ;;  %1237 = vst [vmem:[%s2139_s21 + $0x388] sm:$0xff] %v846_v6  ;;  %v1103_v8 = vpop.f32.mrb[69].mxu1 }
 0x25f   : > { %1239 = vst [vmem:[%s2139_s21 + $0x398] sm:$0xff] %v1103_v8 }
 0x260   : > { %v850_v9 = vpop.f32.mrb[70].mxu0 }
 0x261   : > { %1240 = vst [vmem:[%s2139_s21 + $0x3a0] sm:$0xff] %v850_v9  ;;  %v1107_v10 = vpop.f32.mrb[70].mxu1  ;;  %v852_v11 = vpop.f32.mrb[71].mxu0 }
 0x262   : > { %1242 = vst [vmem:[%s2139_s21 + $0x3b0] sm:$0xff] %v1107_v10  ;;  %1241 = vst [vmem:[%s2139_s21 + $0x3a8] sm:$0xff] %v852_v11  ;;  %v1109_v12 = vpop.f32.mrb[71].mxu1 }
 0x263   : > { %1243 = vst [vmem:[%s2139_s21 + $0x3b8] sm:$0xff] %v1109_v12 }
 0x264   : > { %v856_v13 = vpop.f32.mrb[72].mxu0 }
 0x265   : > { %1244 = vst [vmem:[%s2139_s21 + $0x3c0] sm:$0xff] %v856_v13  ;;  %v1113_v14 = vpop.f32.mrb[72].mxu1  ;;  %v858_v15 = vpop.f32.mrb[73].mxu0 }
 0x266   : > { %1246 = vst [vmem:[%s2139_s21 + $0x3d0] sm:$0xff] %v1113_v14  ;;  %1245 = vst [vmem:[%s2139_s21 + $0x3c8] sm:$0xff] %v858_v15  ;;  %v1115_v16 = vpop.f32.mrb[73].mxu1 }
 0x267   : > { %1247 = vst [vmem:[%s2139_s21 + $0x3d8] sm:$0xff] %v1115_v16 }
 0x268   : > { %v862_v17 = vpop.f32.mrb[74].mxu0 }
 0x269   : > { %1248 = vst [vmem:[%s2139_s21 + $0x3e0] sm:$0xff] %v862_v17  ;;  %v1119_v18 = vpop.f32.mrb[74].mxu1  ;;  %v864_v19 = vpop.f32.mrb[75].mxu0 }
 0x26a   : > { %1250 = vst [vmem:[%s2139_s21 + $0x3f0] sm:$0xff] %v1119_v18  ;;  %1249 = vst [vmem:[%s2139_s21 + $0x3e8] sm:$0xff] %v864_v19  ;;  %v1121_v20 = vpop.f32.mrb[75].mxu1 }
 0x26b   : > { %1251 = vst [vmem:[%s2139_s21 + $0x3f8] sm:$0xff] %v1121_v20 }
 0x26c   : > { %1591 = shalt.err (!%p1588_p5)
}
 0x26d   : > { %s1592_s6 = scalar_lea.hbm %s2270_s28, 16384  ;;  %s1596_s10 = scalar_lea.hbm %s2329_s3, 32768 }
 0x26e   : > { %p1593_p6 = scmp.ne.s32.totalorder %s2270_s28, %s1592_s6  ;;  %p1597_p10 = scmp.lt.u32.totalorder %s2270_s28, %s2329_s3 }
 0x26f   : > { %p1598_p11 = scmp.lt.u32.totalorder %s1596_s10, %s1592_s6  ;;  %p1600_p13 = scmp.lt.u32.totalorder %s1592_s6, %s2270_s28 }
 0x270   : > { %p1594_p7 = pnand %p1593_p6, %p1722_p4 }
 0x271   : > { %p1599_p12 = por %p1598_p11, %p1597_p10 }
 0x272   : > { %p1595_p9 = pneg %p1594_p7 }
 0x273   : > { %p1601_p0 = por %p1600_p13, %p1599_p12 }
 0x275   : > { %p1602_p1 = pnand %p1601_p0, %p1595_p9 }
 0x277   : > { %1605 = shalt.err (!%p1602_p1)
}
 0x278   : > { %s1660_s19 = smov 512   ;;  %s1661_s21 = smov 32  }
 0x279   : > { %1520 = dma.vmem_to_hbm [thread:$0]  (%p1722_p4), %s2272_s9, 16384, %s2270_s28, %s2280_s15, %s1660_s19, %s1660_s19, %s1661_s21  }
 0x27a PF: > { %p1526_p2 = scmp.ge.s32.totalorder %s1656_s17, 2  ;;  %s1284_s23 = sand.u32 1, %s1636_s12  }
 0x27b   : > { %s1285_s26 = scalar_lea.sflag [#allocation3], %s1284_s23 }
 0x27c   : > { %p1523_p3 = pnand %p1526_p2, %p1729_p8 }
 0x27e   : > { %1631 = dma.done.wait (!%p1523_p3), %s1285_s26, 16384  }
 0x27f   : > { %1633 = vsyncadd (!%p1523_p3), %s1285_s26, 4294950912  ;;  %s16_s17 = sadd.s32 1, %s1656_s17   ;;  %s2332_s12 = smov %s1640_s13 }
 0x280   : > { %p13_p5 = scmp.ge.s32.totalorder %s16_s17, 4   ;;  %s2333_s13 = smov %s1644_s14 }
 0x281   : > { %s2334_s14 = smov %s1735_s25  ;;  %s2335_s15 = smov %s1652_s16 }
 0x282   : > { %s2336_s16 = smov %s2338_s20  ;;  %15 = sbr.rel (!%p13_p5) target bundleno = 4 (0x4), region = 70 }
 0x289   :  { %1290 = vsyncpa [#allocation3], 1 }
 0x28a   :  { %1292 = vsyncpa [#allocation3 + $0x1], 1 }

</bundles_post_ra>
